<compile_context>
chip_gen: v7x
topology: tpu7x:2x2x1
jax: 0.10.0
libtpu: 0.0.40
codegen_flags: <defaults>
</compile_context>

<pallas_src>
import functools

import jax
import jax.numpy as jnp
from jax.experimental import pallas as pl
from jax.experimental.pallas import tpu as pltpu


def _round_up(x, m):
    return ((x + m - 1) // m) * m


def affinity_kernel(xa_ref, xb_ref, w1a_ref, w1b_ref, b1_ref, w2_ref, b2_ref,
                    out_ref):
    # Cast the streamed f32 activation tiles to bf16 in-register (no HBM pass).
    xa = xa_ref[...].astype(jnp.bfloat16)            # (TB, D)
    xb = xb_ref[...].astype(jnp.bfloat16)            # (TB, D)

    # fc1 on the MXU, split over the concat: [xa|xb] @ W1 = xa@W1a + xb@W1b.
    h = jnp.dot(xa, w1a_ref[...], preferred_element_type=jnp.float32)
    h = h + jnp.dot(xb, w1b_ref[...], preferred_element_type=jnp.float32)
    h = jnp.maximum(h + b1_ref[...], 0.0)            # bias + ReLU in f32
    h = h.astype(jnp.bfloat16)                       # (TB, HP) bf16 for fc2

    # fc2: contract the hidden (lane) axis of h against the single w2 row.
    # Result is (1, TB) with batch on lanes -> dense vst output store, and the
    # MXU free dim is TB (not 1).
    y = jnp.einsum("oh,bh->ob", w2_ref[...], h,
                   preferred_element_type=jnp.float32)
    y = y + b2_ref[0]                                # scalar bias from SMEM

    # sigmoid: exp + approximate reciprocal both run on the otherwise-idle EUP.
    out_ref[0] = pl.reciprocal(1.0 + jnp.exp(-y), approx=True)


@functools.partial(jax.jit, static_argnames=("block_b",))
def affinity_forward(antisense_feat, mrna_feat, w1, b1, w2, b2, *, block_b=4096):
    """Pallas forward of AffinityNetwork.

    antisense_feat, mrna_feat: (B, D) float32
    w1: (2D, H), b1: (H,), w2: (H, 1), b2: (1,)   (x @ W layout)
    Returns (B, 1) float32 affinities.
    """
    B, D = antisense_feat.shape
    H = w1.shape[1]
    HP = _round_up(H, 128)                           # pad hidden dim to lane width

    # ---- parameter prep (tiny; runs per call, cost negligible) --------------
    w1_bf = w1.astype(jnp.bfloat16)
    w1a = jnp.zeros((D, HP), jnp.bfloat16).at[:, :H].set(w1_bf[:D])
    w1b = jnp.zeros((D, HP), jnp.bfloat16).at[:, :H].set(w1_bf[D:])
    b1p = jnp.zeros((1, HP), jnp.float32).at[0, :H].set(b1.astype(jnp.float32))
    w2p = jnp.zeros((1, HP), jnp.bfloat16).at[0, :H].set(w2[:, 0].astype(jnp.bfloat16))
    b2s = b2.reshape(1).astype(jnp.float32)

    # ---- batch tiling: lane-width multiples, no activation padding ----------
    tb_cap = _round_up(max(block_b, 128), 128)
    # Keep at least two tiles whenever B allows it so the "parallel" axis can
    # feed both TensorCores on v7x (harmless on v5e/v6e).
    TB = min(tb_cap, _round_up(max(pl.cdiv(B, 2), 1), 128))
    G = pl.cdiv(B, TB)                               # ragged final block allowed

    out = pl.pallas_call(
        affinity_kernel,
        out_shape=jax.ShapeDtypeStruct((G, 1, TB), jnp.float32),
        grid=(G,),
        in_specs=[
            pl.BlockSpec((TB, D), lambda i: (i, 0)),            # antisense tile
            pl.BlockSpec((TB, D), lambda i: (i, 0)),            # mrna tile
            pl.BlockSpec((D, HP), lambda i: (0, 0)),            # W1 (antisense half)
            pl.BlockSpec((D, HP), lambda i: (0, 0)),            # W1 (mrna half)
            pl.BlockSpec((1, HP), lambda i: (0, 0)),            # b1
            pl.BlockSpec((1, HP), lambda i: (0, 0)),            # w2 row (bf16)
            pl.BlockSpec(memory_space=pltpu.MemorySpace.SMEM),  # b2 scalar
        ],
        out_specs=pl.BlockSpec((1, 1, TB), lambda i: (i, 0, 0)),
        compiler_params=pltpu.CompilerParams(
            dimension_semantics=("parallel",),                  # megacore on v7x
        ),
        cost_estimate=pl.CostEstimate(
            flops=2 * B * (2 * D) * HP + 2 * B * HP,
            transcendentals=B,
            bytes_accessed=2 * B * D * 4 + B * 4 + 2 * (2 * D) * HP,
        ),
    )(antisense_feat, mrna_feat, w1a, w1b, b1p, w2p, b2s)

    # (G, 1, TB) lane-dense slab -> (B, 1); rows past B (ragged tile) are
    # garbage from undefined reads and are sliced off here before any use.
    return out.reshape(G * TB)[:B].reshape(B, 1)


def init_params(input_dim, key):
    """Deterministic parameter init mirroring nn.Linear shapes.
    fc1: Linear(2*input_dim, 64), fc2: Linear(64, 1).
    PyTorch-style uniform(-1/sqrt(fan_in), 1/sqrt(fan_in)), stored as (in, out)."""
    k1, k2, k3, k4 = jax.random.split(key, 4)
    fan1 = 2 * input_dim
    bound1 = 1.0 / jnp.sqrt(fan1)
    w1 = jax.random.uniform(k1, (fan1, 64), jnp.float32, -bound1, bound1)
    b1 = jax.random.uniform(k2, (64,), jnp.float32, -bound1, bound1)
    fan2 = 64
    bound2 = 1.0 / jnp.sqrt(fan2)
    w2 = jax.random.uniform(k3, (fan2, 1), jnp.float32, -bound2, bound2)
    b2 = jax.random.uniform(k4, (1,), jnp.float32, -bound2, bound2)
    return w1, b1, w2, b2


def reference_forward(antisense_feat, mrna_feat, w1, b1, w2, b2):
    """Pure-JAX f32 reference mirroring the PyTorch module exactly."""
    x = jnp.concatenate([antisense_feat, mrna_feat], axis=1)
    h = jax.nn.relu(x @ w1 + b1)
    return jax.nn.sigmoid(h @ w2 + b2)


if __name__ == "__main__":
    key = jax.random.PRNGKey(0)
    k_a, k_m, k_p = jax.random.split(key, 3)

    B = 8     # batch
    D = 32    # per-input feature dim (fc1 input is 2*D = 64)

    antisense_feat = jax.random.normal(k_a, (B, D), jnp.float32)
    mrna_feat = jax.random.normal(k_m, (B, D), jnp.float32)
    w1, b1, w2, b2 = init_params(D, k_p)

    out = affinity_forward(antisense_feat, mrna_feat, w1, b1, w2, b2)
    out = jax.block_until_ready(out)
    ref = reference_forward(antisense_feat, mrna_feat, w1, b1, w2, b2)
    assert out.shape == (B, 1)
    # bf16 weight/activation stream + EUP approx reciprocal vs exact f32
    # reference: observed error ~1e-3, so 2e-2 is a comfortably safe bound.
    assert jnp.allclose(out, ref, atol=2e-2, rtol=0.0), (out, ref)

    # Multi-tile path with a ragged final block (small block_b -> G=3).
    B2 = 300
    k_a2, k_m2 = jax.random.split(k_a)
    a2 = jax.random.normal(k_a2, (B2, D), jnp.float32)
    m2 = jax.random.normal(k_m2, (B2, D), jnp.float32)
    out2 = jax.block_until_ready(
        affinity_forward(a2, m2, w1, b1, w2, b2, block_b=128))
    ref2 = reference_forward(a2, m2, w1, b1, w2, b2)
    assert out2.shape == (B2, 1)
    assert jnp.allclose(out2, ref2, atol=2e-2, rtol=0.0), (out2, ref2)

    # Default large-tile config: exercises the G>=2 heuristic (TB=256, G=2).
    out3 = jax.block_until_ready(affinity_forward(a2, m2, w1, b1, w2, b2))
    assert out3.shape == (B2, 1)
    assert jnp.allclose(out3, ref2, atol=2e-2, rtol=0.0), (out3, ref2)

    print("KERNEL_OK")
</pallas_src>

<mosaic_0001>
module attributes {stable_mosaic.version = 11 : i64} {
  func.func @affinity_kernel(%arg0: i32, %arg1: memref<128x32xf32, #tpu.memory_space<vmem>>, %arg2: memref<128x32xf32, #tpu.memory_space<vmem>>, %arg3: memref<32x128xbf16, #tpu.memory_space<vmem>>, %arg4: memref<32x128xbf16, #tpu.memory_space<vmem>>, %arg5: memref<1x128xf32, #tpu.memory_space<vmem>>, %arg6: memref<1x128xbf16, #tpu.memory_space<vmem>>, %arg7: memref<1xf32, #tpu.memory_space<smem>>, %arg8: memref<1x1x128xf32, #tpu.memory_space<vmem>>) attributes {dimension_semantics = [#tpu.dimension_semantics<parallel>], iteration_bounds = array<i64: 1>, scalar_prefetch = 0 : i64, scratch_operands = 0 : i64, tpu.core_type = #tpu.core_type<tc>, window_params = [{transform_indices = @transform_0, window_bounds = array<i64: 128, 32>}, {transform_indices = @transform_1, window_bounds = array<i64: 128, 32>}, {pipeline_mode = #tpu.pipeline_mode<synchronous>, transform_indices = @transform_2, window_bounds = array<i64: 32, 128>}, {pipeline_mode = #tpu.pipeline_mode<synchronous>, transform_indices = @transform_3, window_bounds = array<i64: 32, 128>}, {pipeline_mode = #tpu.pipeline_mode<synchronous>, transform_indices = @transform_4, window_bounds = array<i64: 1, 128>}, {pipeline_mode = #tpu.pipeline_mode<synchronous>, transform_indices = @transform_5, window_bounds = array<i64: 1, 128>}, {transform_indices = @transform_6, window_bounds = array<i64: 1>}, {transform_indices = @transform_7, window_bounds = array<i64: 1, 1, 128>}]} {
    %c0 = arith.constant 0 : index
    %c0_0 = arith.constant 0 : index
    %0 = vector.load %arg1[%c0, %c0_0] : memref<128x32xf32, #tpu.memory_space<vmem>>, vector<128x32xf32>
    %1 = arith.truncf %0 : vector<128x32xf32> to vector<128x32xbf16>
    %c0_1 = arith.constant 0 : index
    %c0_2 = arith.constant 0 : index
    %2 = vector.load %arg2[%c0_1, %c0_2] : memref<128x32xf32, #tpu.memory_space<vmem>>, vector<128x32xf32>
    %3 = arith.truncf %2 : vector<128x32xf32> to vector<128x32xbf16>
    %c0_3 = arith.constant 0 : index
    %c0_4 = arith.constant 0 : index
    %4 = vector.load %arg3[%c0_3, %c0_4] : memref<32x128xbf16, #tpu.memory_space<vmem>>, vector<32x128xbf16>
    %cst = arith.constant dense<0.000000e+00> : vector<128x128xf32>
    %5 = tpu.matmul %1, %4, %cst {dimension_numbers = #tpu.dot_dimension_numbers<[1], [0], [0], [1], [0, 0, 1, 1], [], []>} : vector<128x32xbf16>, vector<32x128xbf16>, vector<128x128xf32> -> vector<128x128xf32>
    %c0_5 = arith.constant 0 : index
    %c0_6 = arith.constant 0 : index
    %6 = vector.load %arg4[%c0_5, %c0_6] : memref<32x128xbf16, #tpu.memory_space<vmem>>, vector<32x128xbf16>
    %cst_7 = arith.constant dense<0.000000e+00> : vector<128x128xf32>
    %7 = tpu.matmul %3, %6, %cst_7 {dimension_numbers = #tpu.dot_dimension_numbers<[1], [0], [0], [1], [0, 0, 1, 1], [], []>} : vector<128x32xbf16>, vector<32x128xbf16>, vector<128x128xf32> -> vector<128x128xf32>
    %8 = arith.addf %5, %7 : vector<128x128xf32>
    %c0_8 = arith.constant 0 : index
    %c0_9 = arith.constant 0 : index
    %9 = vector.load %arg5[%c0_8, %c0_9] : memref<1x128xf32, #tpu.memory_space<vmem>>, vector<1x128xf32>
    %10 = vector.broadcast %9 : vector<1x128xf32> to vector<128x128xf32>
    %11 = arith.addf %8, %10 : vector<128x128xf32>
    %cst_10 = arith.constant 0.000000e+00 : f32
    %12 = vector.broadcast %cst_10 : f32 to vector<128x128xf32>
    %13 = arith.maximumf %11, %12 : vector<128x128xf32>
    %14 = arith.truncf %13 : vector<128x128xf32> to vector<128x128xbf16>
    %c0_11 = arith.constant 0 : index
    %c0_12 = arith.constant 0 : index
    %15 = vector.load %arg6[%c0_11, %c0_12] : memref<1x128xbf16, #tpu.memory_space<vmem>>, vector<1x128xbf16>
    "tpu.trace_start"() <{level = 10 : i32, message = "oh,bh->ob"}> : () -> ()
    %cst_13 = arith.constant dense<0.000000e+00> : vector<1x128xf32>
    %16 = tpu.matmul %15, %14, %cst_13 {dimension_numbers = #tpu.dot_dimension_numbers<[1], [1], [0], [0], [0, 0, 1, 0], [], []>} : vector<1x128xbf16>, vector<128x128xbf16>, vector<1x128xf32> -> vector<1x128xf32>
    "tpu.trace_stop"() : () -> ()
    %c0_14 = arith.constant 0 : index
    %17 = memref.load %arg7[%c0_14] : memref<1xf32, #tpu.memory_space<smem>>
    %18 = vector.broadcast %17 : f32 to vector<1x128xf32>
    %19 = arith.addf %16, %18 : vector<1x128xf32>
    %cst_15 = arith.constant 0.000000e+00 : f32
    %20 = vector.broadcast %cst_15 : f32 to vector<1x128xf32>
    %21 = arith.subf %20, %19 : vector<1x128xf32>
    %22 = math.exp %21 : vector<1x128xf32>
    %cst_16 = arith.constant 1.000000e+00 : f32
    %23 = vector.broadcast %cst_16 : f32 to vector<1x128xf32>
    %24 = arith.addf %23, %22 : vector<1x128xf32>
    %25 = tpu.reciprocal %24 {approx = true} : vector<1x128xf32> -> vector<1x128xf32>
    %c0_17 = arith.constant 0 : index
    %c0_18 = arith.constant 0 : index
    %c0_19 = arith.constant 0 : index
    %26 = vector.load %arg8[%c0_17, %c0_18, %c0_19] : memref<1x1x128xf32, #tpu.memory_space<vmem>>, vector<1x1x128xf32>
    %27 = vector.shape_cast %26 : vector<1x1x128xf32> to vector<1x128xf32>
    %28 = vector.shape_cast %25 : vector<1x128xf32> to vector<1x1x128xf32>
    tpu.vector_store %arg8[%c0_17, %c0_18, %c0_19], %28 {strides = array<i32>} : memref<1x1x128xf32, #tpu.memory_space<vmem>>, vector<1x1x128xf32>,
    return
  }
  func.func @transform_0(%arg0: i32) -> (i32, i32) {
    %c0_i32 = arith.constant 0 : i32
    %c0_i32_0 = arith.constant 0 : i32
    return %arg0, %c0_i32 : i32, i32
  }
  func.func @transform_1(%arg0: i32) -> (i32, i32) {
    %c0_i32 = arith.constant 0 : i32
    %c0_i32_0 = arith.constant 0 : i32
    return %arg0, %c0_i32 : i32, i32
  }
  func.func @transform_2(%arg0: i32) -> (i32, i32) {
    %c0_i32 = arith.constant 0 : i32
    %c0_i32_0 = arith.constant 0 : i32
    %c0_i32_1 = arith.constant 0 : i32
    return %c0_i32, %c0_i32_0 : i32, i32
  }
  func.func @transform_3(%arg0: i32) -> (i32, i32) {
    %c0_i32 = arith.constant 0 : i32
    %c0_i32_0 = arith.constant 0 : i32
    %c0_i32_1 = arith.constant 0 : i32
    return %c0_i32, %c0_i32_0 : i32, i32
  }
  func.func @transform_4(%arg0: i32) -> (i32, i32) {
    %c0_i32 = arith.constant 0 : i32
    %c0_i32_0 = arith.constant 0 : i32
    %c0_i32_1 = arith.constant 0 : i32
    return %c0_i32, %c0_i32_0 : i32, i32
  }
  func.func @transform_5(%arg0: i32) -> (i32, i32) {
    %c0_i32 = arith.constant 0 : i32
    %c0_i32_0 = arith.constant 0 : i32
    %c0_i32_1 = arith.constant 0 : i32
    return %c0_i32, %c0_i32_0 : i32, i32
  }
  func.func @transform_6(%arg0: i32) -> i32 {
    %c0_i32 = arith.constant 0 : i32
    %c0_i32_0 = arith.constant 0 : i32
    return %c0_i32 : i32
  }
  func.func @transform_7(%arg0: i32) -> (i32, i32, i32) {
    %c0_i32 = arith.constant 0 : i32
    %c0_i32_0 = arith.constant 0 : i32
    %c0_i32_1 = arith.constant 0 : i32
    return %arg0, %c0_i32, %c0_i32_0 : i32, i32, i32
  }
}

</mosaic_0001>

<bundles_post_ra>
// kernel: affinity_forward.1
= control target key start
LH: loop header
LB: loop body
LE: loop exit
PB: predicated region body
PF: predicated region fallthrough
CT: control target
= control target key end

     0   :  { %vm96_vm0 = vcmask 261120   ;;  %v587_v52 = vmov 0.0   ;;  %vm588_vm1 = vmmov 0   ;;  %s774_s3 = inlined_call_operand.vmem [shape: bf16[32,128], index: 3, kind: input, shape index: {}]   ;;  %s775_s1 = inlined_call_operand.vmem [shape: f32[8,32], index: 1, kind: input, shape index: {}]   ;;  %s776_s2 = inlined_call_operand.vmem [shape: bf16[32,128], index: 2, kind: input, shape index: {}]   ;;  %s777_s0 = inlined_call_operand.vmem [shape: f32[8,32], index: 0, kind: input, shape index: {}]   ;;  %s778_s4 = inlined_call_operand.vmem [shape: f32[1,128], index: 4, kind: input, shape index: {}]   ;;  %s779_s5 = inlined_call_operand.vmem [shape: bf16[1,128], index: 5, kind: input, shape index: {}]   ;;  %s780_s6 = inlined_call_operand.<no memory space> [shape: f32[1], index: 6, kind: input, shape index: {}]   ;;  %s781_s7 = inlined_call_operand.vmem [shape: f32[1,1,128], index: 7, kind: output, shape index: {}]  }
   0x1   :  { %v579_v0 = vld [vmem:[%s774_s3] sm:$0xff]   ;;  %v580_v1 = vld [vmem:[%s774_s3 + $0x8] sm:$0xff]   ;;  %v54_v4 = vld [vmem:[%s775_s1 + $0x10] sm:$0xff]  ;;  %541 = vmatprep.subr.bf16.mxu1 %v587_v52  ;;  %557 = vmatprep.mubr.msk.bf16.mxu1 %vm588_vm1, %v587_v52 }
   0x2   :  { %501 = vmatprep.subr.bf16.mxu0 %v579_v0  ;;  %v52_v2 = vld [vmem:[%s775_s1] sm:$0xff]  ;;  %v53_v3 = vld [vmem:[%s775_s1 + $0x8] sm:$0xff]  ;;  %v55_v6 = vld [vmem:[%s775_s1 + $0x18] sm:$0xff] }
   0x3   :  { %502 = vmatpush3.bf16.msra.mxu0 %v579_v0  ;;  %v68_v5 = vpack.c.bf16 %v53_v3, %v52_v2  ;;  %v581_v7 = vld [vmem:[%s776_s2] sm:$0xff]   ;;  %v57_v9 = vld [vmem:[%s775_s1 + $0x28] sm:$0xff]  ;;  %v69_v10 = vpack.c.bf16 %v55_v6, %v54_v4  ;;  %v58_v13 = vld [vmem:[%s775_s1 + $0x30] sm:$0xff] }
   0x4   :  { %503 = vmatprep.subr.bf16.mxu0 %v580_v1  ;;  %v56_v8 = vld [vmem:[%s775_s1 + $0x20] sm:$0xff]  ;;  %v582_v12 = vld [vmem:[%s776_s2 + $0x8] sm:$0xff]   ;;  %v59_v14 = vld [vmem:[%s775_s1 + $0x38] sm:$0xff] }
   0x5   :  { %505 = vmatprep.mubr.msk.bf16.mxu0 %vm96_vm0, %v68_v5  ;;  %v70_v11 = vpack.c.bf16 %v57_v9, %v56_v8  ;;  %v60_v15 = vld [vmem:[%s775_s1 + $0x40] sm:$0xff]  ;;  %v61_v16 = vld [vmem:[%s775_s1 + $0x48] sm:$0xff]  ;;  %v71_v17 = vpack.c.bf16 %v59_v14, %v58_v13  ;;  %v62_v19 = vld [vmem:[%s775_s1 + $0x50] sm:$0xff] }
   0x6   :  { %v72_v18 = vpack.c.bf16 %v61_v16, %v60_v15  ;;  %v63_v20 = vld [vmem:[%s775_s1 + $0x58] sm:$0xff]  ;;  %v64_v21 = vld [vmem:[%s775_s1 + $0x60] sm:$0xff]  ;;  %v65_v22 = vld [vmem:[%s775_s1 + $0x68] sm:$0xff] }
   0x7   :  { %504 = vmatpush3.bf16.msra.mxu0 %v580_v1  ;;  %v73_v23 = vpack.c.bf16 %v63_v20, %v62_v19  ;;  %v74_v24 = vpack.c.bf16 %v65_v22, %v64_v21  ;;  %v66_v25 = vld [vmem:[%s775_s1 + $0x70] sm:$0xff]  ;;  %v67_v26 = vld [vmem:[%s775_s1 + $0x78] sm:$0xff]  ;;  %v28_v27 = vld [vmem:[%s777_s0] sm:$0xff] }
   0x8   :  { %521 = vmatprep.subr.bf16.mxu0 %v581_v7  ;;  %v29_v28 = vld [vmem:[%s777_s0 + $0x8] sm:$0xff]  ;;  %v75_v29 = vpack.c.bf16 %v67_v26, %v66_v25  ;;  %v30_v31 = vld [vmem:[%s777_s0 + $0x10] sm:$0xff]  ;;  %v31_v32 = vld [vmem:[%s777_s0 + $0x18] sm:$0xff] }
   0x9   :  { %v44_v30 = vpack.c.bf16 %v29_v28, %v28_v27  ;;  %v32_v33 = vld [vmem:[%s777_s0 + $0x20] sm:$0xff]  ;;  %v33_v34 = vld [vmem:[%s777_s0 + $0x28] sm:$0xff]  ;;  %v45_v35 = vpack.c.bf16 %v31_v32, %v30_v31  ;;  %v34_v37 = vld [vmem:[%s777_s0 + $0x30] sm:$0xff] }
   0xa   :  { %506 = vmatmul.mubr.msk.bf16.vlgmr.msra.gmra.mrb[0].mxu0 %vm96_vm0, %v69_v10  ;;  %v46_v36 = vpack.c.bf16 %v33_v34, %v32_v33  ;;  %v35_v38 = vld [vmem:[%s777_s0 + $0x38] sm:$0xff]  ;;  %v36_v39 = vld [vmem:[%s777_s0 + $0x40] sm:$0xff]  ;;  %v37_v40 = vld [vmem:[%s777_s0 + $0x48] sm:$0xff] }
   0xb   :  { %522 = vmatpush3.bf16.msra.mxu0 %v581_v7  ;;  %509 = vmatprep.mubr.msk.bf16.mxu0 %vm96_vm0, %v70_v11  ;;  %v47_v41 = vpack.c.bf16 %v35_v38, %v34_v37  ;;  %v48_v42 = vpack.c.bf16 %v37_v40, %v36_v39  ;;  %v38_v43 = vld [vmem:[%s777_s0 + $0x50] sm:$0xff]  ;;  %v39_v44 = vld [vmem:[%s777_s0 + $0x58] sm:$0xff]  ;;  %v40_v45 = vld [vmem:[%s777_s0 + $0x60] sm:$0xff] }
   0xc   :  { %523 = vmatprep.subr.bf16.mxu0 %v582_v12  ;;  %v41_v46 = vld [vmem:[%s777_s0 + $0x68] sm:$0xff]  ;;  %v49_v47 = vpack.c.bf16 %v39_v44, %v38_v43  ;;  %v42_v49 = vld [vmem:[%s777_s0 + $0x70] sm:$0xff]  ;;  %v43_v50 = vld [vmem:[%s777_s0 + $0x78] sm:$0xff] }
   0xd   :  { %v50_v48 = vpack.c.bf16 %v41_v46, %v40_v45  ;;  %v51_v51 = vpack.c.bf16 %v43_v50, %v42_v49  ;;  %v471_v53 = vld [vmem:[%s778_s4] ss:$0 sm:$0xff] }
   0xe   :  { %v398_v46 = vld [vmem:[%s779_s5] sm:$0x1] }
   0xf   :  { %524 = vmatpush3.bf16.msra.mxu0 %v582_v12 }
  0x12   :  { %510 = vmatmul.mubr.msk.bf16.gmra.mrb[4].mxu0 %vm96_vm0, %v71_v17 }
  0x13   :  { %513 = vmatprep.mubr.msk.bf16.mxu0 %vm96_vm0, %v72_v18 }
  0x1a   :  { %514 = vmatmul.mubr.msk.bf16.gmra.mrb[8].mxu0 %vm96_vm0, %v73_v23 }
  0x1b   :  { %517 = vmatprep.mubr.msk.bf16.mxu0 %vm96_vm0, %v74_v24 }
  0x22   :  { %518 = vmatmul.mubr.msk.bf16.gmra.mrb[12].mxu0 %vm96_vm0, %v75_v29 }
  0x23   :  { %525 = vmatprep.mubr.msk.bf16.mxu0 %vm96_vm0, %v44_v30 }
  0x2a   :  { %526 = vmatmul.mubr.msk.bf16.vlgmr.msra.gmra.mrb[0].mxu0 %vm96_vm0, %v45_v35 }
  0x2b   :  { %529 = vmatprep.mubr.msk.bf16.mxu0 %vm96_vm0, %v46_v36 }
  0x32   :  { %530 = vmatmul.mubr.msk.bf16.gmra.mrb[4].mxu0 %vm96_vm0, %v47_v41 }
  0x33   :  { %533 = vmatprep.mubr.msk.bf16.mxu0 %vm96_vm0, %v48_v42 }
  0x3a   :  { %534 = vmatmul.mubr.msk.bf16.gmra.mrb[8].mxu0 %vm96_vm0, %v49_v47  ;;  %v400_v47 = vstv %s780_s6 }
  0x3b   :  { %537 = vmatprep.mubr.msk.bf16.mxu0 %vm96_vm0, %v50_v48 }
  0x42   :  { %538 = vmatmul.mubr.msk.bf16.gmra.mrb[12].mxu0 %vm96_vm0, %v51_v51 }
  0xfd   :  { %v527_v54 = vpop.f32.mrb[0].mxu0 }
  0xfe   :  { %v360_v55 = vadd.f32 %v527_v54, %v471_v53  ;;  %v288_v56 = vpop.f32.mrb[1].mxu0 }
  0xff   :  { %v358_v57 = vadd.f32 %v471_v53, %v288_v56  ;;  %v528_v58 = vpop.f32.mrb[2].mxu0 }
 0x100   :  { %v361_v59 = vadd.f32 %v528_v58, %v471_v53  ;;  %v291_v60 = vpop.f32.mrb[3].mxu0  ;;  %v376_v62 = vmax.f32 %v360_v55, 0.0 }
 0x101   :  { %v359_v61 = vadd.f32 %v471_v53, %v291_v60  ;;  %v374_v0 = vmax.f32 %v358_v57, 0.0 }
 0x102   :  { %v377_v63 = vmax.f32 %v361_v59, 0.0 }
 0x103   :  { %v375_v1 = vmax.f32 %v359_v61, 0.0 }
 0x104   :  { %v391_v2 = vpack.c.bf16 %v377_v63, %v376_v62 }
 0x105   :  { %v531_v3 = vpop.f32.mrb[4].mxu0  ;;  %v390_v4 = vpack.c.bf16 %v375_v1, %v374_v0 }
 0x106   :  { %v364_v5 = vadd.f32 %v531_v3, %v471_v53  ;;  %v304_v6 = vpop.f32.mrb[5].mxu0 }
 0x107   :  { %v362_v7 = vadd.f32 %v471_v53, %v304_v6  ;;  %v532_v8 = vpop.f32.mrb[6].mxu0  ;;  %542 = vmatpush3.bf16.xpose.msra.mxu1 %v390_v4 }
 0x108   :  { %v365_v9 = vadd.f32 %v532_v8, %v471_v53  ;;  %v307_v10 = vpop.f32.mrb[7].mxu0  ;;  %543 = vmatprep.subr.bf16.mxu1 %v587_v52  ;;  %v380_v12 = vmax.f32 %v364_v5, 0.0 }
 0x109   :  { %v363_v11 = vadd.f32 %v471_v53, %v307_v10  ;;  %v378_v14 = vmax.f32 %v362_v7, 0.0 }
 0x10a   :  { %v381_v13 = vmax.f32 %v365_v9, 0.0 }
 0x10b   :  { %v379_v15 = vmax.f32 %v363_v11, 0.0 }
 0x10c   :  { %v393_v16 = vpack.c.bf16 %v381_v13, %v380_v12 }
 0x10d   :  { %v392_v17 = vpack.c.bf16 %v379_v15, %v378_v14  ;;  %v535_v18 = vpop.f32.mrb[8].mxu0 }
 0x10e   :  { %v368_v19 = vadd.f32 %v535_v18, %v471_v53  ;;  %v320_v20 = vpop.f32.mrb[9].mxu0 }
 0x10f   :  { %v366_v21 = vadd.f32 %v471_v53, %v320_v20  ;;  %v536_v22 = vpop.f32.mrb[10].mxu0  ;;  %544 = vmatpush3.bf16.xpose.msra.mxu1 %v391_v2 }
 0x110   :  { %v369_v23 = vadd.f32 %v536_v22, %v471_v53  ;;  %v323_v24 = vpop.f32.mrb[11].mxu0  ;;  %545 = vmatprep.subr.bf16.mxu1 %v587_v52  ;;  %v384_v26 = vmax.f32 %v368_v19, 0.0 }
 0x111   :  { %v367_v25 = vadd.f32 %v471_v53, %v323_v24  ;;  %v382_v28 = vmax.f32 %v366_v21, 0.0 }
 0x112   :  { %v385_v27 = vmax.f32 %v369_v23, 0.0 }
 0x113   :  { %v383_v29 = vmax.f32 %v367_v25, 0.0 }
 0x114   :  { %v395_v30 = vpack.c.bf16 %v385_v27, %v384_v26 }
 0x115   :  { %v394_v31 = vpack.c.bf16 %v383_v29, %v382_v28  ;;  %v539_v32 = vpop.f32.mrb[12].mxu0 }
 0x116   :  { %v372_v33 = vadd.f32 %v539_v32, %v471_v53  ;;  %v336_v34 = vpop.f32.mrb[13].mxu0 }
 0x117   :  { %v370_v35 = vadd.f32 %v471_v53, %v336_v34  ;;  %v540_v36 = vpop.f32.mrb[14].mxu0  ;;  %546 = vmatpush3.bf16.xpose.msra.mxu1 %v392_v17 }
 0x118   :  { %v373_v37 = vadd.f32 %v540_v36, %v471_v53  ;;  %v339_v38 = vpop.f32.mrb[15].mxu0  ;;  %547 = vmatprep.subr.bf16.mxu1 %v587_v52  ;;  %v388_v40 = vmax.f32 %v372_v33, 0.0 }
 0x119   :  { %v371_v39 = vadd.f32 %v471_v53, %v339_v38  ;;  %v386_v42 = vmax.f32 %v370_v35, 0.0 }
 0x11a   :  { %v389_v41 = vmax.f32 %v373_v37, 0.0 }
 0x11b   :  { %v387_v43 = vmax.f32 %v371_v39, 0.0 }
 0x11c   :  { %v397_v44 = vpack.c.bf16 %v389_v41, %v388_v40 }
 0x11d   :  { %v396_v45 = vpack.c.bf16 %v387_v43, %v386_v42 }
 0x11f   :  { %548 = vmatpush3.bf16.xpose.msra.mxu1 %v393_v16 }
 0x120   :  { %549 = vmatprep.subr.bf16.mxu1 %v587_v52 }
 0x127   :  { %550 = vmatpush3.bf16.xpose.msra.mxu1 %v394_v31 }
 0x128   :  { %551 = vmatprep.subr.bf16.mxu1 %v587_v52 }
 0x12f   :  { %552 = vmatpush3.bf16.xpose.msra.mxu1 %v395_v30 }
 0x130   :  { %553 = vmatprep.subr.bf16.mxu1 %v587_v52 }
 0x137   :  { %554 = vmatpush3.bf16.xpose.msra.mxu1 %v396_v45 }
 0x138   :  { %555 = vmatprep.subr.bf16.mxu1 %v587_v52 }
 0x13f   :  { %556 = vmatpush3.bf16.xpose.msra.mxu1 %v397_v44 }
 0x146   :  { %558 = vmatmul.mubr.bf16.vlgmr.msra.gmra.mrb[0].mxu1 %v398_v46 }
 0x219   :  { %v435_v48 = vpop.f32.mrb[0].mxu1 }
 0x21a   :  { %v436_v49 = vadd.f32 %v435_v48, %v400_v47  ;;  %v559_v50 = vpop.f32.mrb[1].mxu1 }
 0x21b   :  { %v438_v51 = vpop.f32.mrb[2].mxu1 }
 0x21c   :  { %v441_v53 = vsub.f32 0.0, %v436_v49  ;;  %v560_v54 = vpop.f32.mrb[3].mxu1 }
 0x21e   :  { %v442_v55 = vmul.f32 1.442695, %v441_v53 }
 0x220   :  { %583 = vpow2.f32 %v442_v55 }
 0x22a   :  { %v584_v56 = vpop.eup %583 }
 0x22b   :  { %v444_v52 = vadd.f32 1.0, %v584_v56 }
 0x22d   :  { %585 = vrcp.f32 %v444_v52 }
 0x237   :  { %v586_v57 = vpop.eup %585 }
 0x238   :  { %446 = vst [vmem:[%s781_s7] sm:$0x1] %v586_v57 }

</bundles_post_ra>
